<compile_context>
chip_gen: v6e
topology: v6e:2x2x1
jax: 0.10.0
libtpu: 0.0.40
codegen_flags: <defaults>
</compile_context>

<pallas_src>
import functools

import jax
import jax.numpy as jnp
from jax.experimental import pallas as pl
from jax.experimental.pallas import tpu as pltpu

LANE = 128


def _round_up(x, m):
    return (x + m - 1) // m * m


def mlp_kernel(x_ref, w_ref, b_ref, o_ref, *, n_layers):
    """Fused MLP: (linear -> relu) x (n_layers - 1), then final linear.

    x_ref: (TILE_B, F)      bf16 activation tile (lane-padded features)
    w_ref: (L, F, F)        bf16 packed weight slab (single block / single DMA)
    b_ref: (L, 1, F)        f32  packed bias slab   (single block / single DMA)
    o_ref: (TILE_B, F)      f32  lane-dense output tile
    """
    h = x_ref[...]                                   # bf16
    for l in range(n_layers):                        # static unroll, L is tiny
        acc = jnp.dot(h, w_ref[l],
                      preferred_element_type=jnp.float32) + b_ref[l]
        if l < n_layers - 1:
            acc = jnp.maximum(acc, 0.0)              # ReLU in f32 (free on VPU)
            h = acc.astype(jnp.bfloat16)             # bf16 MXU input, f32 accumulate
        else:
            o_ref[...] = acc                         # full-lane (unmasked) store


def mlp_forward(x, params, *, tile_b=128):
    """params: dict with 'w' = list of (in, out) f32 weights (== PyTorch W^T),
    'b' = list of (out,) f32 biases."""
    ws, bs = params["w"], params["b"]
    n_layers = len(ws)
    B, n_in = x.shape
    n_out = ws[-1].shape[1]

    # One shared lane-dense feature width for all (padded) layers.
    F = _round_up(max([n_in] + [w.shape[1] for w in ws]), LANE)

    # Pack all weights / biases into two slabs -> 2 parameter DMAs total.
    w_slab = jnp.zeros((n_layers, F, F), jnp.float32)
    b_slab = jnp.zeros((n_layers, 1, F), jnp.float32)
    for l, (w, b) in enumerate(zip(ws, bs)):
        w_slab = w_slab.at[l, : w.shape[0], : w.shape[1]].set(w)
        b_slab = b_slab.at[l, 0, : b.shape[0]].set(b)
    w_slab = w_slab.astype(jnp.bfloat16)

    # Pad activations: batch rows to the tile multiple, features to F.
    tile_b = max(8, min(tile_b, _round_up(B, 8)))
    Bp = _round_up(B, tile_b)
    x_p = jnp.zeros((Bp, F), jnp.bfloat16).at[:B, :n_in].set(
        x.astype(jnp.bfloat16))

    grid = (Bp // tile_b,)
    flops = 2 * B * sum(w.shape[0] * w.shape[1] for w in ws)
    bytes_accessed = int(x_p.size * 2 + w_slab.size * 2
                         + b_slab.size * 4 + Bp * F * 4)

    out = pl.pallas_call(
        functools.partial(mlp_kernel, n_layers=n_layers),
        out_shape=jax.ShapeDtypeStruct((Bp, F), jnp.float32),
        grid_spec=pltpu.PrefetchScalarGridSpec(
            num_scalar_prefetch=0,
            grid=grid,
            in_specs=[
                pl.BlockSpec((tile_b, F), lambda i: (i, 0)),          # x tile
                pl.BlockSpec((n_layers, F, F), lambda i: (0, 0, 0)),  # weights (resident)
                pl.BlockSpec((n_layers, 1, F), lambda i: (0, 0, 0)),  # biases  (resident)
            ],
            out_specs=pl.BlockSpec((tile_b, F), lambda i: (i, 0)),
        ),
        compiler_params=pltpu.CompilerParams(
            dimension_semantics=("parallel",)),
        cost_estimate=pl.CostEstimate(
            flops=flops, transcendentals=0, bytes_accessed=bytes_accessed),
    )(x_p, w_slab, b_slab)

    return out[:B, :n_out]


def init_params(key, n_inputs, mlp_width, mlp_depth, n_outputs):
    """PyTorch-nn.Linear-like uniform(-1/sqrt(fan_in)) init; weights stored
    transposed as (in, out) so the kernel computes x @ W directly."""
    dims = [n_inputs] + [mlp_width] * (mlp_depth - 1) + [n_outputs]
    keys = jax.random.split(key, len(dims) - 1)
    ws, bs = [], []
    for k, fan_in, fan_out in zip(keys, dims[:-1], dims[1:]):
        bound = 1.0 / jnp.sqrt(fan_in)
        kw, kb = jax.random.split(k)
        ws.append(jax.random.uniform(kw, (fan_in, fan_out),
                                     minval=-bound, maxval=bound,
                                     dtype=jnp.float32))
        bs.append(jax.random.uniform(kb, (fan_out,),
                                     minval=-bound, maxval=bound,
                                     dtype=jnp.float32))
    return dict(w=ws, b=bs)


def mlp_reference(x, params):
    """Pure-JAX reference mirroring the kernel's dtype pattern
    (bf16 matmul inputs, f32 accumulation / bias / ReLU)."""
    ws, bs = params["w"], params["b"]
    h = x.astype(jnp.bfloat16)
    for l, (w, b) in enumerate(zip(ws, bs)):
        h = jnp.dot(h, w.astype(jnp.bfloat16),
                    preferred_element_type=jnp.float32) + b
        if l < len(ws) - 1:
            h = jnp.maximum(h, 0.0).astype(jnp.bfloat16)
    return h


if __name__ == "__main__":
    # hparams: mlp_width=32, mlp_depth=3, mlp_dropout=0.0 ; MLP(n_inputs=16, n_outputs=8)
    n_inputs, mlp_width, mlp_depth, n_outputs = 16, 32, 3, 8
    batch = 256                      # grid of 2 batch tiles (TILE_B=128)

    key = jax.random.PRNGKey(0)
    kx, kp = jax.random.split(key)
    x = jax.random.normal(kx, (batch, n_inputs), dtype=jnp.float32)
    params = init_params(kp, n_inputs, mlp_width, mlp_depth, n_outputs)

    out = jax.block_until_ready(mlp_forward(x, params))
    ref = jax.block_until_ready(mlp_reference(x, params))

    assert out.shape == (batch, n_outputs), out.shape
    assert jnp.allclose(out, ref, atol=1e-3, rtol=1e-3), "mismatch vs JAX reference"

    print("KERNEL_OK")
</pallas_src>

<mosaic_0001>
module attributes {stable_mosaic.version = 11 : i64} {
  func.func @mlp_kernel(%arg0: i32, %arg1: memref<128x128xbf16, #tpu.memory_space<vmem>>, %arg2: memref<3x128x128xbf16, #tpu.memory_space<vmem>>, %arg3: memref<3x1x128xf32, #tpu.memory_space<vmem>>, %arg4: memref<128x128xf32, #tpu.memory_space<vmem>>) attributes {dimension_semantics = [#tpu.dimension_semantics<parallel>], iteration_bounds = array<i64: 2>, scalar_prefetch = 0 : i64, scratch_operands = 0 : i64, tpu.core_type = #tpu.core_type<tc>, window_params = [{transform_indices = @transform_0, window_bounds = array<i64: 128, 128>}, {pipeline_mode = #tpu.pipeline_mode<synchronous>, transform_indices = @transform_1, window_bounds = array<i64: 3, 128, 128>}, {pipeline_mode = #tpu.pipeline_mode<synchronous>, transform_indices = @transform_2, window_bounds = array<i64: 3, 1, 128>}, {transform_indices = @transform_3, window_bounds = array<i64: 128, 128>}]} {
    %c0 = arith.constant 0 : index
    %c0_0 = arith.constant 0 : index
    %0 = vector.load %arg1[%c0, %c0_0] : memref<128x128xbf16, #tpu.memory_space<vmem>>, vector<128x128xbf16>
    %c0_1 = arith.constant 0 : index
    %c0_2 = arith.constant 0 : index
    %c0_3 = arith.constant 0 : index
    %1 = vector.load %arg2[%c0_1, %c0_2, %c0_3] : memref<3x128x128xbf16, #tpu.memory_space<vmem>>, vector<1x128x128xbf16>
    %2 = vector.shape_cast %1 : vector<1x128x128xbf16> to vector<128x128xbf16>
    %cst = arith.constant dense<0.000000e+00> : vector<128x128xf32>
    %3 = tpu.matmul %0, %2, %cst {dimension_numbers = #tpu.dot_dimension_numbers<[1], [0], [0], [1], [0, 0, 1, 1], [], []>} : vector<128x128xbf16>, vector<128x128xbf16>, vector<128x128xf32> -> vector<128x128xf32>
    %c0_4 = arith.constant 0 : index
    %c0_5 = arith.constant 0 : index
    %c0_6 = arith.constant 0 : index
    %4 = vector.load %arg3[%c0_4, %c0_5, %c0_6] : memref<3x1x128xf32, #tpu.memory_space<vmem>>, vector<1x1x128xf32>
    %5 = vector.shape_cast %4 : vector<1x1x128xf32> to vector<1x128xf32>
    %6 = vector.broadcast %5 : vector<1x128xf32> to vector<128x128xf32>
    %7 = arith.addf %3, %6 : vector<128x128xf32>
    %cst_7 = arith.constant 0.000000e+00 : f32
    %8 = vector.broadcast %cst_7 : f32 to vector<128x128xf32>
    %9 = arith.maximumf %7, %8 : vector<128x128xf32>
    %10 = arith.truncf %9 : vector<128x128xf32> to vector<128x128xbf16>
    %c1 = arith.constant 1 : index
    %c0_8 = arith.constant 0 : index
    %c0_9 = arith.constant 0 : index
    %11 = vector.load %arg2[%c1, %c0_8, %c0_9] : memref<3x128x128xbf16, #tpu.memory_space<vmem>>, vector<1x128x128xbf16>
    %12 = vector.shape_cast %11 : vector<1x128x128xbf16> to vector<128x128xbf16>
    %cst_10 = arith.constant dense<0.000000e+00> : vector<128x128xf32>
    %13 = tpu.matmul %10, %12, %cst_10 {dimension_numbers = #tpu.dot_dimension_numbers<[1], [0], [0], [1], [0, 0, 1, 1], [], []>} : vector<128x128xbf16>, vector<128x128xbf16>, vector<128x128xf32> -> vector<128x128xf32>
    %c1_11 = arith.constant 1 : index
    %c0_12 = arith.constant 0 : index
    %c0_13 = arith.constant 0 : index
    %14 = vector.load %arg3[%c1_11, %c0_12, %c0_13] : memref<3x1x128xf32, #tpu.memory_space<vmem>>, vector<1x1x128xf32>
    %15 = vector.shape_cast %14 : vector<1x1x128xf32> to vector<1x128xf32>
    %16 = vector.broadcast %15 : vector<1x128xf32> to vector<128x128xf32>
    %17 = arith.addf %13, %16 : vector<128x128xf32>
    %cst_14 = arith.constant 0.000000e+00 : f32
    %18 = vector.broadcast %cst_14 : f32 to vector<128x128xf32>
    %19 = arith.maximumf %17, %18 : vector<128x128xf32>
    %20 = arith.truncf %19 : vector<128x128xf32> to vector<128x128xbf16>
    %c2 = arith.constant 2 : index
    %c0_15 = arith.constant 0 : index
    %c0_16 = arith.constant 0 : index
    %21 = vector.load %arg2[%c2, %c0_15, %c0_16] : memref<3x128x128xbf16, #tpu.memory_space<vmem>>, vector<1x128x128xbf16>
    %22 = vector.shape_cast %21 : vector<1x128x128xbf16> to vector<128x128xbf16>
    %cst_17 = arith.constant dense<0.000000e+00> : vector<128x128xf32>
    %23 = tpu.matmul %20, %22, %cst_17 {dimension_numbers = #tpu.dot_dimension_numbers<[1], [0], [0], [1], [0, 0, 1, 1], [], []>} : vector<128x128xbf16>, vector<128x128xbf16>, vector<128x128xf32> -> vector<128x128xf32>
    %c2_18 = arith.constant 2 : index
    %c0_19 = arith.constant 0 : index
    %c0_20 = arith.constant 0 : index
    %24 = vector.load %arg3[%c2_18, %c0_19, %c0_20] : memref<3x1x128xf32, #tpu.memory_space<vmem>>, vector<1x1x128xf32>
    %25 = vector.shape_cast %24 : vector<1x1x128xf32> to vector<1x128xf32>
    %26 = vector.broadcast %25 : vector<1x128xf32> to vector<128x128xf32>
    %27 = arith.addf %23, %26 : vector<128x128xf32>
    %c0_21 = arith.constant 0 : index
    %c0_22 = arith.constant 0 : index
    %28 = vector.load %arg4[%c0_21, %c0_22] : memref<128x128xf32, #tpu.memory_space<vmem>>, vector<128x128xf32>
    tpu.vector_store %arg4[%c0_21, %c0_22], %27 {strides = array<i32>} : memref<128x128xf32, #tpu.memory_space<vmem>>, vector<128x128xf32>,
    return
  }
  func.func @transform_0(%arg0: i32) -> (i32, i32) {
    %c0_i32 = arith.constant 0 : i32
    %c0_i32_0 = arith.constant 0 : i32
    return %arg0, %c0_i32 : i32, i32
  }
  func.func @transform_1(%arg0: i32) -> (i32, i32, i32) {
    %c0_i32 = arith.constant 0 : i32
    %c0_i32_0 = arith.constant 0 : i32
    %c0_i32_1 = arith.constant 0 : i32
    %c0_i32_2 = arith.constant 0 : i32
    return %c0_i32, %c0_i32_0, %c0_i32_1 : i32, i32, i32
  }
  func.func @transform_2(%arg0: i32) -> (i32, i32, i32) {
    %c0_i32 = arith.constant 0 : i32
    %c0_i32_0 = arith.constant 0 : i32
    %c0_i32_1 = arith.constant 0 : i32
    %c0_i32_2 = arith.constant 0 : i32
    return %c0_i32, %c0_i32_0, %c0_i32_1 : i32, i32, i32
  }
  func.func @transform_3(%arg0: i32) -> (i32, i32) {
    %c0_i32 = arith.constant 0 : i32
    %c0_i32_0 = arith.constant 0 : i32
    return %arg0, %c0_i32 : i32, i32
  }
}

</mosaic_0001>

<bundles_post_ra>
// kernel: tpu_custom_call.1
= control target key start
LH: loop header
LB: loop body
LE: loop exit
PB: predicated region body
PF: predicated region fallthrough
CT: control target
= control target key end

     0   :  { %8 = vsyncpa [#allocation3], 0  ;;  %s1627_s0 = inlined_call_operand.hbm [shape: bf16[256,128], index: 0, kind: input, shape index: {}]   ;;  %s1628_s1 = inlined_call_operand.hbm [shape: bf16[3,128,128], index: 1, kind: input, shape index: {}]   ;;  %s1629_s2 = inlined_call_operand.vmem [shape: f32[3,1,128], index: 2, kind: input, shape index: {}]   ;;  %s1630_s3 = inlined_call_operand.hbm [shape: f32[256,128], index: 3, kind: output, shape index: {}]  }
   0x1   :  { %10 = vsyncpa [#allocation3 + $0x1], 0 }
   0x2   :  { %11 = vsyncpa [#allocation6], 0 }
   0x3   :  { %12 = vsyncpa [#allocation4], 0 }
   0x4   :  { %14 = vsyncpa [#allocation4 + $0x1], 0  ;;  %s1399_s12 = smov 0   ;;  %s1401_s13 = smov 0  }
   0x5   :  { %s1403_s14 = smov 0   ;;  %s1405_s15 = smov 0  }
   0x6 LB: > { %s1420_s16 = sadd.s32 4294967295, %s1370_s15   ;;  %s940_s17 = sadd.s32 4294967294, %s1370_s15   ;;  %s1370_s15 = sphi %s1405_s15, %s1652_s15   ;;  %s1366_s14 = sphi %s1403_s14, %s1651_s14   ;;  %s1362_s13 = sphi %s1401_s13, %s1650_s13   ;;  %s1358_s12 = sphi %s1399_s12, %s1649_s12  }
   0x7   : > { %p40_p0 = scmp.ne.s32.totalorder %s1362_s13, %s1358_s12  ;;  %p1631_p1 = scmp.eq.s32.totalorder %s1420_s16, 0 }
   0x8   : > { %p112_p3 = scmp.eq.s32.totalorder %s940_s17, 1  ;;  %p941_p5 = scmp.ge.s32.totalorder %s1370_s15, 1 }
   0x9   : > { %p1429_p4 = por %p1631_p1, %p40_p0  ;;  %p119_p7 = scmp.lt.s32.totalorder %s1370_s15, 3 }
   0xa   : > { %p1434_p6 = por %p112_p3, %p40_p0  ;;  %s1372_s21 = smov [#allocation5]  }
   0xb   : > { %s1635_s18 = scalar_select %p1429_p4, 1, 0 }
   0xc   : > { %s1636_s19 = scalar_select %p1434_p6, 1, 0 }
   0xd   : > { %p1439_p8 = pnand %p941_p5, %p119_p7  ;;  %s131_s22 = sshll.u32 %s1372_s21, 4  ;;  %s132_s22 = int_to_ptr.vmem [resolvable:$true] %s131_s22 }
   0xe   : > { %s1453_s24 = sadd.s32 1, %s1370_s15   ;;  %s27_s25 = sadd.s32 1, %s1366_s14 }
   0xf   : > { %s1637_s20 = scalar_select %p1439_p8, 1, 0 }
  0x10   : > { %p1163_p9 = pneg %p1439_p8  ;;  %s24_s26 = ssub.s32 %s1370_s15, %s1453_s24 }
  0x11   : > { %s1259_s27 = scalar_lea.vmem %s132_s22, 3072  ;;  %p1267_p5 = scmp.lt.s32.totalorder %s132_s22, %s132_s22 }
  0x12   : > { %p1448_p11 = pnand %p1163_p9, %p1631_p1  ;;  %p1260_p13 = scmp.ne.s32.totalorder %s132_s22, %s1259_s27 }
  0x13   : > { %p1268_p7 = scmp.lt.s32.totalorder %s1259_s27, %s1259_s27 }
  0x14   : > { %p1250_p12 = pneg %p1448_p11 }
  0x15   : > { %p1269_p10 = por %p1268_p7, %p1267_p5 }
  0x16   : > { %p1262_p0 = pnand %p1260_p13, %p1250_p12 }
  0x18   : > { %p1263_p3 = pneg %p1262_p0 }
  0x1a   : > { %p1270_p2 = pnand %p1269_p10, %p1263_p3 }
  0x1c   : > { %1273 = shalt.err (!%p1270_p2)
}
  0x1d   : > { %s1373_s28 = smov 64   ;;  %s1374_s29 = smov 4  }
  0x1e   : > { %1166 = dma.hbm_to_vmem [thread:$0]  (!%p1448_p11), %s1628_s1, 3072, %s132_s22, [#allocation6], %s1373_s28, %s1373_s28, %s1374_s29  }
  0x1f   : > { %p25_p2 = scmp.eq.s32.totalorder %s24_s26, 0  ;;  %p34_p9 = scmp.ne.s32.totalorder %s1366_s14, %s1362_s13 }
  0x20   : > { %p35_p10 = scmp.eq.s32.totalorder %s1370_s15, 0  ;;  %p1176_p12 = scmp.lt.s32.totalorder %s1370_s15, 2 }
  0x21   : > { %s1473_s5 = scalar_select %p25_p2, %s1366_s14, %s27_s25  }
  0x22   : > { %p36_p13 = por %p35_p10, %p34_p9  ;;  %p1639_p0 = scmp.eq.s32.totalorder %s1420_s16, 1 }
  0x23   : > { %s148_s7 = sand.u32 1, %s1366_s14   ;;  %s993_s8 = sshll.u32 %s1370_s15, 10 }
  0x24   : > { %p1477_p3 = por %p1639_p0, %p34_p9  ;;  %s944_s9 = sshll.u32 %s148_s7, 6 }
  0x25   : > { %s1486_s17 = scalar_lea.hbm %s1627_s0, %s993_s8  ;;  %s152_s21 = scalar_lea.vmem [#allocation2], %s944_s9 }
  0x26   : > { %s1640_s6 = scalar_select %p1477_p3, 1, 0 }
  0x27   : > { %s159_s22 = sshll.u32 %s152_s21, 4  ;;  %p1488_p11 = pnand %p1176_p12, %p36_p13  ;;  %s1492_s22 = int_to_ptr.vmem [resolvable:$true] %s159_s22 }
  0x28   : > { %s1494_s25 = scalar_lea.sflag [#allocation3], %s148_s7  ;;  %s1274_s26 = scalar_lea.hbm %s1486_s17, 1024 }
  0x29   : > { %p1275_p5 = scmp.ne.s32.totalorder %s1486_s17, %s1274_s26  ;;  %p1276_p7 = pneg %p1488_p11 }
  0x2a   : > { %s1279_s4 = scalar_lea.hbm %s1627_s0, 2048  ;;  %p1280_p10 = scmp.lt.s32.totalorder %s1486_s17, %s1627_s0 }
  0x2b   : > { %p1277_p2 = pnand %p1276_p7, %p1275_p5  ;;  %p1281_p12 = scmp.lt.s32.totalorder %s1279_s4, %s1274_s26 }
  0x2d   : > { %p1278_p9 = pneg %p1277_p2  ;;  %p1282_p13 = por %p1281_p12, %p1280_p10 }
  0x2f   : > { %p1283_p0 = pnand %p1282_p13, %p1278_p9 }
  0x31   : > { %1286 = shalt.err (!%p1283_p0)
}
  0x32   : > { %s1287_s7 = scalar_lea.vmem %s1492_s22, 1024  ;;  %s1375_s10 = smov [#allocation2]  }
  0x33   : > { %p1288_p1 = scmp.ne.s32.totalorder %s1492_s22, %s1287_s7  ;;  %s1292_s11 = sshll.u32 %s1375_s10, 4  ;;  %s1293_s11 = int_to_ptr.vmem [resolvable:$false] %s1292_s11 }
  0x34   : > { %s1294_s21 = scalar_lea.vmem %s1293_s11, 2048  ;;  %p1295_p2 = scmp.lt.s32.totalorder %s1492_s22, %s1293_s11 }
  0x35   : > { %p1290_p6 = pnand %p1288_p1, %p1276_p7  ;;  %p1296_p3 = scmp.lt.s32.totalorder %s1294_s21, %s1287_s7 }
  0x37   : > { %p1291_p5 = pneg %p1290_p6  ;;  %p1297_p4 = por %p1296_p3, %p1295_p2 }
  0x39   : > { %p1298_p8 = pnand %p1297_p4, %p1291_p5 }
  0x3b   : > { %1301 = shalt.err (!%p1298_p8)
}
  0x3c   : > { %1170 = dma.hbm_to_vmem [thread:$0]  (!%p1488_p11), %s1486_s17, 1024, %s1492_s22, %s1494_s25, %s1373_s28, %s1373_s28, %s1374_s29  }
  0x3d   : > { %p1642_p1 = scmp.ne.s32.totalorder %s1637_s20, 0 }
  0x3e   : > { %s1521_s26 = sand.u32 (!%p1642_p1), 1, %s1362_s13   ;;  %p1643_p4 = scmp.ne.s32.totalorder (!%p1642_p1), %s1635_s18, 0 }
  0x3f   : > { %171 = sbr.rel (%p1642_p1) target bundleno = 756 (0x2f4), region = 32  ;;  %s948_s27 = sshll.u32 (!%p1642_p1), %s1521_s26, 6 }
  0x40   : > { %s174_s30 = scalar_lea.sflag (!%p1642_p1), [#allocation3], %s1521_s26  ;;  %s1525_s4 = scalar_lea.vmem (!%p1642_p1), [#allocation2], %s948_s27 }
  0x44   : > { %1345 = dma.done.wait (%p1643_p4), %s174_s30, 1024  }
  0x45   : > { %1347 = vsyncadd (%p1643_p4), %s174_s30, 4294966272  ;;  %p1644_p6 = scmp.eq.s32.totalorder %s1420_s16, 0 }
  0x47   : > { %1349 = dma.done.wait (%p1644_p6), [#allocation6], 3072   ;;  %p1645_p8 = pmov %p1644_p6 }
  0x48   : > { %v1216_v0 = vld [vmem:[#allocation5 + $0x38] sm:$0xff]   ;;  %v1217_v1 = vld [vmem:[#allocation5 + $0x30] sm:$0xff]   ;;  %v1218_v2 = vld [vmem:[#allocation5 + $0x28] sm:$0xff]   ;;  %s950_s17 = sshll.u32 %s1521_s26, 7  ;;  %s994_s8 = sshll.u32 %s1420_s16, 11 }
  0x49   : > { %1351 = vsyncadd (%p1645_p8), [#allocation6], 4294964224  ;;  %1043 = vmatprep.subr.bf16.mxu0 %v1216_v0  ;;  %v1219_v3 = vld [vmem:[#allocation5 + $0x20] sm:$0xff]   ;;  %v1220_v5 = vld [vmem:[#allocation5 + $0x18] sm:$0xff]   ;;  %s1559_s25 = scalar_lea.vmem [#allocation7], %s950_s17  ;;  %s1580_s11 = scalar_lea.hbm %s1630_s3, %s994_s8 }
  0x4a   : > { %1044 = vmatpush3.bf16.msra.mxu0 %v1216_v0  ;;  %v1224_v4 = vld [vmem:[%s1525_s4] sm:$0xff]   ;;  %v1221_v6 = vld [vmem:[#allocation5 + $0x10] sm:$0xff]   ;;  %v1232_v7 = vld [vmem:[#allocation5 + $0x78] sm:$0xff]   ;;  %s857_s9 = sshll.u32 %s1559_s25, 4  ;;  %s844_s21 = scalar_lea.sflag [#allocation4], %s1521_s26  ;;  %s1582_s9 = int_to_ptr.vmem [resolvable:$true] %s857_s9 }
  0x4b   : > { %1045 = vmatprep.subr.bf16.mxu0 %v1217_v1  ;;  %1059 = vmatprep.mubr.bf16.mxu0 %v1224_v4  ;;  %v1233_v8 = vld [vmem:[#allocation5 + $0x70] sm:$0xff]   ;;  %v1222_v9 = vld [vmem:[#allocation5 + $0x8] sm:$0xff]   ;;  %v1223_v11 = vld [vmem:[#allocation5] sm:$0xff]   ;;  %s1302_s16 = scalar_lea.vmem %s1582_s9, 2048  ;;  %p1646_p11 = scmp.ne.s32.totalorder %s1640_s6, 0 }
  0x4c   : > { %1075 = vmatprep.subr.bf16.mxu1 %v1232_v7  ;;  %v1234_v10 = vld [vmem:[#allocation5 + $0x68] sm:$0xff]   ;;  %v1235_v12 = vld [vmem:[#allocation5 + $0x60] sm:$0xff]   ;;  %v1236_v13 = vld [vmem:[#allocation5 + $0x58] sm:$0xff]   ;;  %p1303_p3 = scmp.ne.s32.totalorder %s1582_s9, %s1302_s16  ;;  %s1376_s27 = smov [#allocation7]  }
  0x4d   : > { %1076 = vmatpush3.bf16.msra.mxu1 %v1232_v7  ;;  %v1225_v14 = vld [vmem:[%s1525_s4 + $0x8] sm:$0xff]   ;;  %v1226_v15 = vld [vmem:[%s1525_s4 + $0x10] sm:$0xff]   ;;  %v1227_v16 = vld [vmem:[%s1525_s4 + $0x18] sm:$0xff]   ;;  %s1306_s30 = sshll.u32 %s1376_s27, 4  ;;  %s1307_s30 = int_to_ptr.vmem [resolvable:$false] %s1306_s30 }
  0x4e   : > { %1046 = vmatpush3.bf16.msra.mxu0 %v1217_v1  ;;  %1077 = vmatprep.subr.bf16.mxu1 %v1233_v8  ;;  %v1228_v17 = vld [vmem:[%s1525_s4 + $0x20] sm:$0xff]   ;;  %v1229_v18 = vld [vmem:[%s1525_s4 + $0x28] sm:$0xff]   ;;  %v1230_v19 = vld [vmem:[%s1525_s4 + $0x30] sm:$0xff]   ;;  %p1304_p7 = pnand %p1303_p3, %p1646_p11  ;;  %p1309_p10 = scmp.lt.s32.totalorder %s1582_s9, %s1307_s30 }
  0x4f   : > { %1047 = vmatprep.subr.bf16.mxu0 %v1218_v2  ;;  %v1231_v20 = vld [vmem:[%s1525_s4 + $0x38] sm:$0xff]   ;;  %v1237_v21 = vld [vmem:[#allocation5 + $0x50] sm:$0xff]   ;;  %v1238_v22 = vld [vmem:[#allocation5 + $0x48] sm:$0xff]   ;;  %s1308_s4 = scalar_lea.vmem %s1307_s30, 4096 }
  0x50   : > { %v1239_v23 = vld [vmem:[#allocation5 + $0x40] sm:$0xff]   ;;  %v1240_v24 = vld [vmem:[#allocation5 + $0xb8] sm:$0xff]   ;;  %v1241_v25 = vld [vmem:[#allocation5 + $0xb0] sm:$0xff]   ;;  %p1305_p9 = pneg %p1304_p7  ;;  %p1310_p12 = scmp.lt.s32.totalorder %s1308_s4, %s1302_s16 }
  0x51   : > { %1078 = vmatpush3.bf16.msra.mxu1 %v1233_v8  ;;  %v1242_v26 = vld [vmem:[#allocation5 + $0xa8] sm:$0xff]   ;;  %v1243_v27 = vld [vmem:[#allocation5 + $0xa0] sm:$0xff]   ;;  %v1543_v28 = vld [vmem:[#allocation5 + $0x98] sm:$0xff]  }
  0x52   : > { %1048 = vmatpush3.bf16.msra.mxu0 %v1218_v2  ;;  %1079 = vmatprep.subr.bf16.mxu1 %v1234_v10  ;;  %v951_v31 = vld [vmem:[%s1629_s2] ss:$0 sm:$0xff]  ;;  %p1311_p13 = por %p1310_p12, %p1309_p10 }
  0x53   : > { %1049 = vmatprep.subr.bf16.mxu0 %v1219_v3 }
  0x54   : > { %p1312_p0 = pnand %p1311_p13, %p1305_p9 }
  0x55   : > { %1080 = vmatpush3.bf16.msra.mxu1 %v1234_v10 }
  0x56   : > { %1050 = vmatpush3.bf16.msra.mxu0 %v1219_v3  ;;  %1081 = vmatprep.subr.bf16.mxu1 %v1235_v12 }
  0x57   : > { %1051 = vmatprep.subr.bf16.mxu0 %v1220_v5 }
  0x59   : > { %1082 = vmatpush3.bf16.msra.mxu1 %v1235_v12 }
  0x5a   : > { %1052 = vmatpush3.bf16.msra.mxu0 %v1220_v5  ;;  %1083 = vmatprep.subr.bf16.mxu1 %v1236_v13 }
  0x5b   : > { %1053 = vmatprep.subr.bf16.mxu0 %v1221_v6 }
  0x5d   : > { %1084 = vmatpush3.bf16.msra.mxu1 %v1236_v13 }
  0x5e   : > { %1054 = vmatpush3.bf16.msra.mxu0 %v1221_v6  ;;  %1085 = vmatprep.subr.bf16.mxu1 %v1237_v21 }
  0x5f   : > { %1055 = vmatprep.subr.bf16.mxu0 %v1222_v9 }
  0x61   : > { %1086 = vmatpush3.bf16.msra.mxu1 %v1237_v21 }
  0x62   : > { %1056 = vmatpush3.bf16.msra.mxu0 %v1222_v9  ;;  %1087 = vmatprep.subr.bf16.mxu1 %v1238_v22 }
  0x63   : > { %1057 = vmatprep.subr.bf16.mxu0 %v1223_v11 }
  0x65   : > { %1088 = vmatpush3.bf16.msra.mxu1 %v1238_v22  ;;  %v1245_v22 = vld [vmem:[#allocation5 + $0x90] sm:$0xff]  }
  0x66   : > { %1058 = vmatpush3.bf16.msra.mxu0 %v1223_v11  ;;  %1089 = vmatprep.subr.bf16.mxu1 %v1239_v23 }
  0x67   : > { %1107 = vmatprep.subr.bf16.mxu0 %v1240_v24 }
  0x69   : > { %1060 = vmatmul.mubr.bf16.vlgmr.msra.gmra.mxu0 %v1225_v14  ;;  %1090 = vmatpush3.bf16.msra.mxu1 %v1239_v23  ;;  %v1246_v23 = vld [vmem:[#allocation5 + $0x88] sm:$0xff]  }
  0x6a   : > { %1063 = vmatprep.mubr.bf16.mxu0 %v1226_v15  ;;  %1139 = vmatprep.subr.bf16.mxu1 %v1240_v24 }
  0x6b   : > { %1108 = vmatpush3.bf16.msra.mxu0 %v1240_v24 }
  0x6c   : > { %1109 = vmatprep.subr.bf16.mxu0 %v1241_v25 }
  0x6f   : > { %1110 = vmatpush3.bf16.msra.mxu0 %v1241_v25 }
  0x70   : > { %1111 = vmatprep.subr.bf16.mxu0 %v1242_v26 }
  0x71   : > { %1064 = vmatmul.mubr.bf16.gmra.mxu0 %v1227_v16 }
  0x72   : > { %1067 = vmatprep.mubr.bf16.mxu0 %v1228_v17 }
  0x73   : > { %1112 = vmatpush3.bf16.msra.mxu0 %v1242_v26 }
  0x74   : > { %1113 = vmatprep.subr.bf16.mxu0 %v1243_v27 }
  0x77   : > { %1114 = vmatpush3.bf16.msra.mxu0 %v1243_v27 }
  0x78   : > { %1115 = vmatprep.subr.bf16.mxu0 %v1543_v28 }
  0x79   : > { %1068 = vmatmul.mubr.bf16.gmra.mxu0 %v1229_v18 }
  0x7a   : > { %1071 = vmatprep.mubr.bf16.mxu0 %v1230_v19 }
  0x7b   : > { %1116 = vmatpush3.bf16.msra.mxu0 %v1543_v28 }
  0x7c   : > { %1117 = vmatprep.subr.bf16.mxu0 %v1245_v22 }
  0x7f   : > { %1118 = vmatpush3.bf16.msra.mxu0 %v1245_v22 }
  0x80   : > { %1119 = vmatprep.subr.bf16.mxu0 %v1246_v23 }
  0x81   : > { %1072 = vmatmul.mubr.bf16.gmra.mxu0 %v1231_v20 }
  0x83   : > { %1120 = vmatpush3.bf16.msra.mxu0 %v1246_v23 }
 0x129   : > { %v1061_v29 = vpop.f32.mrf.mxu0 }
 0x12a   : > { %v385_v35 = vadd.f32 %v1061_v29, %v951_v31 }
 0x12b   : > { %v376_v30 = vpop.f32.mrf.mxu0 }
 0x12c   : > { %v377_v33 = vadd.f32 %v951_v31, %v376_v30  ;;  %v441_v42 = vmax.f32 %v385_v35, 0.0 }
 0x12d   : > { %v1062_v32 = vpop.f32.mrf.mxu0 }
 0x12e   : > { %v388_v34 = vadd.f32 %v1062_v32, %v951_v31  ;;  %v439_v40 = vmax.f32 %v377_v33, 0.0 }
 0x12f   : > { %v379_v36 = vpop.f32.mrf.mxu0 }
 0x130   : > { %v380_v37 = vadd.f32 %v951_v31, %v379_v36  ;;  %v442_v38 = vmax.f32 %v388_v34, 0.0 }
 0x131   : > { %v1065_v39 = vpop.f32.mrf.mxu0 }
 0x132   : > { %v440_v41 = vmax.f32 %v380_v37, 0.0  ;;  %v456_v45 = vpack.c.bf16 %v442_v38, %v441_v42  ;;  %v401_v49 = vadd.f32 %v1065_v39, %v951_v31 }
 0x133   : > { %v392_v43 = vpop.f32.mrf.mxu0 }
 0x134   : > { %v455_v44 = vpack.c.bf16 %v440_v41, %v439_v40  ;;  %v393_v47 = vadd.f32 %v951_v31, %v392_v43  ;;  %v445_v56 = vmax.f32 %v401_v49, 0.0 }
 0x135   : > { %v1066_v46 = vpop.f32.mrf.mxu0 }
 0x136   : > { %v404_v48 = vadd.f32 %v1066_v46, %v951_v31  ;;  %1091 = vmatprep.mubr.bf16.mxu1 %v455_v44  ;;  %v443_v54 = vmax.f32 %v393_v47, 0.0 }
 0x137   : > { %v395_v50 = vpop.f32.mrf.mxu0  ;;  %1092 = vmatmul.mubr.bf16.vlgmr.msra.gmra.mxu1 %v456_v45 }
 0x138   : > { %v396_v51 = vadd.f32 %v951_v31, %v395_v50  ;;  %1147 = vmatpush3.bf16.msra.mxu1 %v1240_v24  ;;  %v446_v52 = vmax.f32 %v404_v48, 0.0  ;;  %v1247_v24 = vld [vmem:[#allocation5 + $0x80] sm:$0xff]  }
 0x139   : > { %v1069_v53 = vpop.f32.mrf.mxu0  ;;  %1140 = vmatprep.subr.bf16.mxu1 %v1241_v25  ;;  %1121 = vmatprep.subr.bf16.mxu0 %v1247_v24 }
 0x13a   : > { %v444_v55 = vmax.f32 %v396_v51, 0.0  ;;  %v458_v59 = vpack.c.bf16 %v446_v52, %v445_v56  ;;  %v417_v63 = vadd.f32 %v1069_v53, %v951_v31  ;;  %1122 = vmatpush3.bf16.msra.mxu0 %v1247_v24 }
 0x13b   : > { %v408_v57 = vpop.f32.mrf.mxu0 }
 0x13c   : > { %v457_v58 = vpack.c.bf16 %v444_v55, %v443_v54  ;;  %1148 = vmatpush3.bf16.msra.mxu1 %v1241_v25  ;;  %v409_v61 = vadd.f32 %v951_v31, %v408_v57  ;;  %v449_v6 = vmax.f32 %v417_v63, 0.0 }
 0x13d   : > { %v1070_v60 = vpop.f32.mrf.mxu0  ;;  %1141 = vmatprep.subr.bf16.mxu1 %v1242_v26 }
 0x13e   : > { %v420_v62 = vadd.f32 %v1070_v60, %v951_v31  ;;  %1095 = vmatprep.mubr.bf16.mxu1 %v457_v58  ;;  %v447_v4 = vmax.f32 %v409_v61, 0.0 }
 0x13f   : > { %v411_v0 = vpop.f32.mrf.mxu0  ;;  %1096 = vmatmul.mubr.bf16.gmra.mxu1 %v458_v59 }
 0x140   : > { %v412_v1 = vadd.f32 %v951_v31, %v411_v0  ;;  %1149 = vmatpush3.bf16.msra.mxu1 %v1242_v26  ;;  %v450_v2 = vmax.f32 %v420_v62, 0.0 }
 0x141   : > { %v1073_v3 = vpop.f32.mrf.mxu0  ;;  %1142 = vmatprep.subr.bf16.mxu1 %v1243_v27 }
 0x142   : > { %v448_v5 = vmax.f32 %v412_v1, 0.0  ;;  %v460_v9 = vpack.c.bf16 %v450_v2, %v449_v6  ;;  %v433_v13 = vadd.f32 %v1073_v3, %v951_v31 }
 0x143   : > { %v424_v7 = vpop.f32.mrf.mxu0 }
 0x144   : > { %v459_v8 = vpack.c.bf16 %v448_v5, %v447_v4  ;;  %1150 = vmatpush3.bf16.msra.mxu1 %v1243_v27  ;;  %v425_v11 = vadd.f32 %v951_v31, %v424_v7  ;;  %v453_v19 = vmax.f32 %v433_v13, 0.0  ;;  %v969_v27 = vld [vmem:[%s1629_s2 + $0x1] ss:$0 sm:$0xff] }
 0x145   : > { %v1074_v10 = vpop.f32.mrf.mxu0  ;;  %1143 = vmatprep.subr.bf16.mxu1 %v1543_v28 }
 0x146   : > { %v436_v12 = vadd.f32 %v1074_v10, %v951_v31  ;;  %1099 = vmatprep.mubr.bf16.mxu1 %v459_v8  ;;  %v451_v17 = vmax.f32 %v425_v11, 0.0 }
 0x147   : > { %v427_v14 = vpop.f32.mrf.mxu0  ;;  %1100 = vmatmul.mubr.bf16.gmra.mxu1 %v460_v9 }
 0x148   : > { %v428_v15 = vadd.f32 %v951_v31, %v427_v14  ;;  %1151 = vmatpush3.bf16.msra.mxu1 %v1543_v28  ;;  %v454_v16 = vmax.f32 %v436_v12, 0.0 }
 0x149   : > { %1144 = vmatprep.subr.bf16.mxu1 %v1245_v22 }
 0x14a   : > { %v452_v18 = vmax.f32 %v428_v15, 0.0  ;;  %v462_v21 = vpack.c.bf16 %v454_v16, %v453_v19 }
 0x14c   : > { %v461_v20 = vpack.c.bf16 %v452_v18, %v451_v17  ;;  %1152 = vmatpush3.bf16.msra.mxu1 %v1245_v22  ;;  %v979_v18 = vld [vmem:[%s1629_s2 + $0x2] ss:$0 sm:$0xff] }
 0x14d   : > { %1145 = vmatprep.subr.bf16.mxu1 %v1246_v23 }
 0x14e   : > { %1103 = vmatprep.mubr.bf16.mxu1 %v461_v20 }
 0x14f   : > { %1104 = vmatmul.mubr.bf16.gmra.mxu1 %v462_v21 }
 0x150   : > { %1153 = vmatpush3.bf16.msra.mxu1 %v1246_v23 }
 0x151   : > { %1146 = vmatprep.subr.bf16.mxu1 %v1247_v24 }
 0x154   : > { %1154 = vmatpush3.bf16.msra.mxu1 %v1247_v24 }
 0x1f7   : > { %v1093_v25 = vpop.f32.mrf.mxu1 }
 0x1f8   : > { %v579_v31 = vadd.f32 %v1093_v25, %v969_v27 }
 0x1f9   : > { %v570_v26 = vpop.f32.mrf.mxu1 }
 0x1fa   : > { %v571_v29 = vadd.f32 %v969_v27, %v570_v26  ;;  %v635_v38 = vmax.f32 %v579_v31, 0.0 }
 0x1fb   : > { %v1094_v28 = vpop.f32.mrf.mxu1 }
 0x1fc   : > { %v582_v30 = vadd.f32 %v1094_v28, %v969_v27  ;;  %v633_v36 = vmax.f32 %v571_v29, 0.0 }
 0x1fd   : > { %v573_v32 = vpop.f32.mrf.mxu1 }
 0x1fe   : > { %v574_v33 = vadd.f32 %v969_v27, %v573_v32  ;;  %v636_v34 = vmax.f32 %v582_v30, 0.0 }
 0x1ff   : > { %v1097_v35 = vpop.f32.mrf.mxu1 }
 0x200   : > { %v634_v37 = vmax.f32 %v574_v33, 0.0  ;;  %v650_v41 = vpack.c.bf16 %v636_v34, %v635_v38  ;;  %v595_v45 = vadd.f32 %v1097_v35, %v969_v27 }
 0x201   : > { %v586_v39 = vpop.f32.mrf.mxu1 }
 0x202   : > { %v649_v40 = vpack.c.bf16 %v634_v37, %v633_v36  ;;  %v587_v43 = vadd.f32 %v969_v27, %v586_v39  ;;  %v639_v52 = vmax.f32 %v595_v45, 0.0 }
 0x203   : > { %v1098_v42 = vpop.f32.mrf.mxu1 }
 0x204   : > { %v598_v44 = vadd.f32 %v1098_v42, %v969_v27  ;;  %1123 = vmatprep.mubr.bf16.mxu0 %v649_v40  ;;  %v637_v50 = vmax.f32 %v587_v43, 0.0 }
 0x205   : > { %v589_v46 = vpop.f32.mrf.mxu1  ;;  %1124 = vmatmul.mubr.bf16.vlgmr.msra.gmra.mxu0 %v650_v41 }
 0x206   : > { %v590_v47 = vadd.f32 %v969_v27, %v589_v46  ;;  %v640_v48 = vmax.f32 %v598_v44, 0.0 }
 0x207   : > { %v1101_v49 = vpop.f32.mrf.mxu1 }
 0x208   : > { %v638_v51 = vmax.f32 %v590_v47, 0.0  ;;  %v652_v55 = vpack.c.bf16 %v640_v48, %v639_v52  ;;  %v611_v59 = vadd.f32 %v1101_v49, %v969_v27 }
 0x209   : > { %v602_v53 = vpop.f32.mrf.mxu1 }
 0x20a   : > { %v651_v54 = vpack.c.bf16 %v638_v51, %v637_v50  ;;  %v603_v57 = vadd.f32 %v969_v27, %v602_v53  ;;  %v643_v2 = vmax.f32 %v611_v59, 0.0 }
 0x20b   : > { %v1102_v56 = vpop.f32.mrf.mxu1 }
 0x20c   : > { %v614_v58 = vadd.f32 %v1102_v56, %v969_v27  ;;  %1127 = vmatprep.mubr.bf16.mxu0 %v651_v54  ;;  %v641_v0 = vmax.f32 %v603_v57, 0.0 }
 0x20d   : > { %v605_v60 = vpop.f32.mrf.mxu1  ;;  %1128 = vmatmul.mubr.bf16.gmra.mxu0 %v652_v55 }
 0x20e   : > { %v606_v61 = vadd.f32 %v969_v27, %v605_v60  ;;  %v644_v62 = vmax.f32 %v614_v58, 0.0 }
 0x20f   : > { %v1105_v63 = vpop.f32.mrf.mxu1 }
 0x210   : > { %v642_v1 = vmax.f32 %v606_v61, 0.0  ;;  %v654_v5 = vpack.c.bf16 %v644_v62, %v643_v2  ;;  %v627_v9 = vadd.f32 %v1105_v63, %v969_v27 }
 0x211   : > { %v618_v3 = vpop.f32.mrf.mxu1 }
 0x212   : > { %v653_v4 = vpack.c.bf16 %v642_v1, %v641_v0  ;;  %v619_v7 = vadd.f32 %v969_v27, %v618_v3  ;;  %v647_v15 = vmax.f32 %v627_v9, 0.0 }
 0x213   : > { %v1106_v6 = vpop.f32.mrf.mxu1 }
 0x214   : > { %v630_v8 = vadd.f32 %v1106_v6, %v969_v27  ;;  %1131 = vmatprep.mubr.bf16.mxu1 %v653_v4  ;;  %v645_v13 = vmax.f32 %v619_v7, 0.0 }
 0x215   : > { %v621_v10 = vpop.f32.mrf.mxu1  ;;  %1132 = vmatmul.mubr.bf16.vlgmr.msra.gmra.mxu1 %v654_v5 }
 0x216   : > { %v622_v11 = vadd.f32 %v969_v27, %v621_v10  ;;  %v648_v12 = vmax.f32 %v630_v8, 0.0 }
 0x218   : > { %v646_v14 = vmax.f32 %v622_v11, 0.0  ;;  %v656_v17 = vpack.c.bf16 %v648_v12, %v647_v15 }
 0x21a   : > { %v655_v16 = vpack.c.bf16 %v646_v14, %v645_v13 }
 0x21c   : > { %1135 = vmatprep.mubr.bf16.mxu1 %v655_v16 }
 0x21d   : > { %1136 = vmatmul.mubr.bf16.gmra.mxu1 %v656_v17 }
 0x2c5   : > { %v1125_v19 = vpop.f32.mrf.mxu0 }
 0x2c6   : > { %v773_v20 = vadd.f32 %v1125_v19, %v979_v18 }
 0x2c7   : > { %v764_v21 = vpop.f32.mrf.mxu0 }
 0x2c8   : > { %829 = vst [vmem:[%s1559_s25 + $0x10] sm:$0xff] %v773_v20  ;;  %v765_v22 = vadd.f32 %v979_v18, %v764_v21 }
 0x2c9   : > { %v1126_v23 = vpop.f32.mrf.mxu0 }
 0x2ca   : > { %827 = vst [vmem:[%s1559_s25] sm:$0xff] %v765_v22  ;;  %v776_v24 = vadd.f32 %v1126_v23, %v979_v18 }
 0x2cb   : > { %v767_v25 = vpop.f32.mrf.mxu0 }
 0x2cc   : > { %830 = vst [vmem:[%s1559_s25 + $0x18] sm:$0xff] %v776_v24  ;;  %v768_v26 = vadd.f32 %v979_v18, %v767_v25 }
 0x2cd   : > { %v1129_v27 = vpop.f32.mrf.mxu0 }
 0x2ce   : > { %828 = vst [vmem:[%s1559_s25 + $0x8] sm:$0xff] %v768_v26  ;;  %v789_v28 = vadd.f32 %v1129_v27, %v979_v18 }
 0x2cf   : > { %v780_v29 = vpop.f32.mrf.mxu0 }
 0x2d0   : > { %833 = vst [vmem:[%s1559_s25 + $0x30] sm:$0xff] %v789_v28  ;;  %v781_v30 = vadd.f32 %v979_v18, %v780_v29 }
 0x2d1   : > { %v1130_v31 = vpop.f32.mrf.mxu0 }
 0x2d2   : > { %831 = vst [vmem:[%s1559_s25 + $0x20] sm:$0xff] %v781_v30  ;;  %v792_v32 = vadd.f32 %v1130_v31, %v979_v18 }
 0x2d3   : > { %v783_v33 = vpop.f32.mrf.mxu0 }
 0x2d4   : > { %834 = vst [vmem:[%s1559_s25 + $0x38] sm:$0xff] %v792_v32  ;;  %v784_v34 = vadd.f32 %v979_v18, %v783_v33 }
 0x2d5   : > { %v1133_v35 = vpop.f32.mrf.mxu1 }
 0x2d6   : > { %832 = vst [vmem:[%s1559_s25 + $0x28] sm:$0xff] %v784_v34  ;;  %v805_v36 = vadd.f32 %v1133_v35, %v979_v18 }
 0x2d7   : > { %v796_v37 = vpop.f32.mrf.mxu1 }
 0x2d8   : > { %837 = vst [vmem:[%s1559_s25 + $0x50] sm:$0xff] %v805_v36  ;;  %v797_v38 = vadd.f32 %v979_v18, %v796_v37 }
 0x2d9   : > { %v1134_v39 = vpop.f32.mrf.mxu1 }
 0x2da   : > { %835 = vst [vmem:[%s1559_s25 + $0x40] sm:$0xff] %v797_v38  ;;  %v808_v40 = vadd.f32 %v1134_v39, %v979_v18 }
 0x2db   : > { %v799_v41 = vpop.f32.mrf.mxu1 }
 0x2dc   : > { %838 = vst [vmem:[%s1559_s25 + $0x58] sm:$0xff] %v808_v40  ;;  %v800_v42 = vadd.f32 %v979_v18, %v799_v41 }
 0x2dd   : > { %v1137_v43 = vpop.f32.mrf.mxu1 }
 0x2de   : > { %836 = vst [vmem:[%s1559_s25 + $0x48] sm:$0xff] %v800_v42  ;;  %v821_v44 = vadd.f32 %v1137_v43, %v979_v18 }
 0x2df   : > { %v812_v45 = vpop.f32.mrf.mxu1 }
 0x2e0   : > { %841 = vst [vmem:[%s1559_s25 + $0x70] sm:$0xff] %v821_v44  ;;  %v813_v46 = vadd.f32 %v979_v18, %v812_v45 }
 0x2e1   : > { %v1138_v47 = vpop.f32.mrf.mxu1 }
 0x2e2   : > { %839 = vst [vmem:[%s1559_s25 + $0x60] sm:$0xff] %v813_v46  ;;  %v824_v48 = vadd.f32 %v1138_v47, %v979_v18 }
 0x2e3   : > { %v815_v49 = vpop.f32.mrf.mxu1 }
 0x2e4   : > { %842 = vst [vmem:[%s1559_s25 + $0x78] sm:$0xff] %v824_v48  ;;  %v816_v50 = vadd.f32 %v979_v18, %v815_v49 }
 0x2e6   : > { %840 = vst [vmem:[%s1559_s25 + $0x68] sm:$0xff] %v816_v50 }
 0x2e7   : > { %1315 = shalt.err (!%p1312_p0)
}
 0x2e8   : > { %s1316_s18 = scalar_lea.hbm %s1580_s11, 2048  ;;  %s1320_s29 = scalar_lea.hbm %s1630_s3, 4096 }
 0x2e9   : > { %p1317_p5 = scmp.ne.s32.totalorder %s1580_s11, %s1316_s18  ;;  %p1321_p4 = scmp.lt.s32.totalorder %s1580_s11, %s1630_s3 }
 0x2ea   : > { %p1322_p6 = scmp.lt.s32.totalorder %s1320_s29, %s1316_s18 }
 0x2eb   : > { %p1318_p2 = pnand %p1317_p5, %p1646_p11 }
 0x2ec   : > { %p1323_p8 = por %p1322_p6, %p1321_p4 }
 0x2ed   : > { %p1319_p1 = pneg %p1318_p2 }
 0x2ef   : > { %p1324_p3 = pnand %p1323_p8, %p1319_p1 }
 0x2f1   : > { %1327 = shalt.err (!%p1324_p3)
}
 0x2f2   : > { %s1377_s23 = smov 128   ;;  %s1378_s25 = smov 8  }
 0x2f3   : > { %1161 = dma.vmem_to_hbm [thread:$0]  (%p1646_p11), %s1582_s9, 2048, %s1580_s11, %s844_s21, %s1377_s23, %s1377_s23, %s1378_s25  }
 0x2f4 PF: > { %s872_s8 = sand.u32 1, %s1358_s12   ;;  %p1647_p7 = scmp.ne.s32.totalorder %s1636_s19, 0 }
 0x2f5   : > { %p1648_p9 = scmp.ge.s32.totalorder %s1370_s15, 2  ;;  %s873_s7 = scalar_lea.sflag [#allocation4], %s872_s8 }
 0x2f7   : > { %p1172_p10 = pnand %p1648_p9, %p1647_p7 }
 0x2f9   : > { %p1173_p12 = pneg %p1172_p10 }
 0x2fb   : > { %1353 = dma.done.wait (%p1173_p12), %s873_s7, 2048  }
 0x2fc   : > { %1355 = vsyncadd (%p1173_p12), %s873_s7, 4294965248  ;;  %p17_p13 = scmp.ge.s32.totalorder %s1453_s24, 4   ;;  %s1649_s12 = smov %s1362_s13 }
 0x2fd   : > { %s1650_s13 = smov %s1366_s14  ;;  %s1651_s14 = smov %s1473_s5 }
 0x2fe   : > { %s1652_s15 = smov %s1453_s24  ;;  %19 = sbr.rel (!%p17_p13) target bundleno = 6 (0x6), region = 85 }
 0x303   :  { %878 = vsyncpa [#allocation3], 1 }
 0x304   :  { %880 = vsyncpa [#allocation3 + $0x1], 1 }
 0x305   :  { %881 = vsyncpa [#allocation6], 1 }
 0x306   :  { %882 = vsyncpa [#allocation4], 1 }
 0x307   :  { %884 = vsyncpa [#allocation4 + $0x1], 1 }

</bundles_post_ra>
